<compile_context>
chip_gen: v6e
topology: v6e:2x2x1
jax: 0.10.0
libtpu: 0.0.40
codegen_flags: <defaults>
</compile_context>

<pallas_src>
import math

import jax
import jax.numpy as jnp
from jax.experimental import pallas as pl
from jax.experimental.pallas import tpu as pltpu


# --------------------------------------------------------------------------
# Block-size selection (padding-aware VMEM accounting)
# --------------------------------------------------------------------------
def _round_up(x, m):
    return ((x + m - 1) // m) * m


def _padded_block_bytes(bb, S, T, D, H, training):
    """Padded (sublane/lane) VMEM footprint of one grid step, incl. 2x buffering."""
    lanes_d = _round_up(D, 128)
    n = bb * T
    src_b = bb * _round_up(S, 8) * lanes_d * 4                  # f32 (bb, S, D)
    tgt_b = _round_up(n, 8) * lanes_d * 4                       # f32 (bb*T, D)
    row_b = 8 * _round_up(n, 128) * 4                           # f32 (1, 1, bb*T)
    n_rows = 3 if training else 1                               # y + pred [+ label]
    dbuf = 2 * (src_b + tgt_b + n_rows * row_b)                 # 2x pipeline buffers
    inter = 2 * _round_up(n, 8) * _round_up(H, 128) * 4         # h + ctx_rep (f32)
    wgt = 2 * (2 * _round_up(D, 16) * _round_up(H, 128) * 2 + 8 * 128 * 4)
    return dbuf + inter + wgt


def _choose_blocking(B, S, T, D, H, training, budget_bytes=20 << 20):
    """Pick (block_b, padded_B, grid_steps).

    * block_b is a power-of-two multiple of 8/gcd(T,8) so the flattened tgt
      block (block_b*T, D) satisfies the (8, 128) rule when the grid has >1 step.
    * block_b <= ceil(B/2) so v7x's two TensorCores both get grid steps.
    * padded, double-buffered footprint stays under `budget_bytes` (well inside
      v7x's 32 MiB scoped-VMEM default; v5e/v6e have more physical headroom).
    * B is padded up to a multiple of block_b (masked-off rows are discarded in
      the wrapper), so awkward batch factors never collapse to 1-batch steps.
    """
    cap = max(1, (B + 1) // 2)
    mult = 8 // math.gcd(T, 8)
    if (mult > cap or mult > B
            or _padded_block_bytes(mult, S, T, D, H, training) > budget_bytes):
        # Degenerate shapes: single full-batch step (block dims == array dims,
        # so the (8,128) rule is trivially satisfied).
        # TODO(synk): if T is not a multiple of 8 AND B is huge, pad T instead.
        return B, B, 1
    bb = mult
    while (bb * 2 <= cap
           and _padded_block_bytes(bb * 2, S, T, D, H, training) <= budget_bytes):
        bb *= 2
    b_pad = _round_up(B, bb)
    return bb, b_pad, b_pad // bb


# --------------------------------------------------------------------------
# Shared base-model compute for one grid step (= block_b batches):
#   ctx  = mean_S(src) @ W_src                      (bb, H)    [linearity of mean]
#   h    = tanh( tgt_flat(bb*T, D) @ W_tgt + ctx )  (bb*T, H)  [h stays flat]
#   pred = sum_H( h * w_out_row ) + b_out           (1,1,bb*T) [VPU mul + lane reduce]
# --------------------------------------------------------------------------
def _base_compute(src_ref, tgt_ref, w_src_ref, w_tgt_ref, w_out_ref, b_out_ref):
    bb = src_ref.shape[0]                     # (bb, S, D) f32
    n = tgt_ref.shape[0]                      # (bb*T, D)  f32 (cast here, not wrapper)
    t = n // bb
    h_dim = w_src_ref.shape[1]

    # Context branch: reduce src over S first (f32, XLU), then a tiny (bb,D)@(D,H).
    src_mean = jnp.mean(src_ref[...], axis=1)                          # (bb, D) f32
    ctx = jnp.dot(src_mean.astype(w_src_ref.dtype), w_src_ref[...],
                  preferred_element_type=jnp.float32)                  # (bb, H) f32

    # Target branch: cast to bf16 in-kernel (free on VPU under a memory roofline)
    # and keep the activation flat — no (bb*T,H)->(bb,T,H) reshape of h.
    h = jnp.dot(tgt_ref[...].astype(w_tgt_ref.dtype), w_tgt_ref[...],
                preferred_element_type=jnp.float32)                    # (n, H) f32
    ctx_rep = jnp.broadcast_to(ctx[:, None, :], (bb, t, h_dim)).reshape(n, h_dim)
    h = jnp.tanh(h + ctx_rep)                                          # f32 VPU/EUP

    # N=1 output projection stays off the MXU: VPU multiply + XLU lane reduce.
    pred = jnp.sum(h * w_out_ref[...], axis=-1, keepdims=True)         # (n, 1) f32
    pred = pred + b_out_ref[0, 0]
    return pred.reshape(1, 1, n)                                       # lane-dense row


def _fwd_train_kernel(src_ref, tgt_ref, y_ref, w_src_ref, w_tgt_ref,
                      w_out_ref, b_out_ref, pred_ref, lbl_ref):
    pred = _base_compute(src_ref, tgt_ref, w_src_ref, w_tgt_ref,
                         w_out_ref, b_out_ref)
    pred_ref[...] = pred.astype(pred_ref.dtype)
    # Fused auxiliary-label epilogue:  label = y - base_pred.squeeze(2)
    lbl_ref[...] = (y_ref[...] - pred).astype(lbl_ref.dtype)


def _fwd_eval_kernel(src_ref, tgt_ref, w_src_ref, w_tgt_ref,
                     w_out_ref, b_out_ref, pred_ref):
    pred = _base_compute(src_ref, tgt_ref, w_src_ref, w_tgt_ref,
                         w_out_ref, b_out_ref)
    pred_ref[...] = pred.astype(pred_ref.dtype)


# --------------------------------------------------------------------------
# Wrapper
# --------------------------------------------------------------------------
def with_auxiliary_forward(src, tgt, y=None, *, params, training=True):
    """WithAuxiliary.forward.  src:(B,S,D) f32, tgt:(B,T,D) f32, y:(B,T) f32."""
    w_src, w_tgt, w_out, b_out = params
    B, S, D = src.shape
    _, T, _ = tgt.shape
    H = w_src.shape[1]

    block_b, b_pad, grid_steps = _choose_blocking(B, S, T, D, H, training)
    n_block = block_b * T
    g = grid_steps

    if b_pad > B:  # pad awkward batch factors; padded rows are sliced off below
        pb = b_pad - B
        src = jnp.pad(src, ((0, pb), (0, 0), (0, 0)))
        tgt = jnp.pad(tgt, ((0, pb), (0, 0), (0, 0)))
        if training:
            y = jnp.pad(y, ((0, pb), (0, 0)))

    # f32 tgt, flattened to (B_pad*T, D): a free metadata reshape; the bf16 cast
    # happens inside the kernel so HBM only sees one read of the f32 stream.
    tgt_flat = tgt.reshape(b_pad * T, D)
    w_src_b = w_src.astype(jnp.bfloat16)
    w_tgt_b = w_tgt.astype(jnp.bfloat16)
    w_out_row = w_out.reshape(1, H).astype(jnp.float32)      # (H,1) -> (1,H)
    b_out_2d = b_out.reshape(1, 1).astype(jnp.float32)

    src_spec = pl.BlockSpec((block_b, S, D), lambda i: (i, 0, 0))
    tgt_spec = pl.BlockSpec((n_block, D), lambda i: (i, 0))
    # Lane-dense rows: batch*time lives on the lane axis of a (G, 1, n_block)
    # array; the block's last two dims equal the full array dims.
    row_spec = pl.BlockSpec((1, 1, n_block), lambda i: (i, 0, 0))
    w_specs = [
        pl.BlockSpec((D, H), lambda i: (0, 0)),                           # w_src bf16
        pl.BlockSpec((D, H), lambda i: (0, 0)),                           # w_tgt bf16
        pl.BlockSpec((1, H), lambda i: (0, 0)),                           # w_out row f32
        pl.BlockSpec((1, 1), lambda i: (0, 0), memory_space=pltpu.SMEM),  # b_out scalar
    ]

    bytes_accessed = (b_pad * S * D * 4 + b_pad * T * D * 4
                      + (b_pad * T * 4 if training else 0)
                      + b_pad * T * 4 * (2 if training else 1)
                      + 2 * D * H * 2 + H * 4 + 4)
    cost = pl.CostEstimate(
        flops=2 * b_pad * T * D * H + 2 * b_pad * D * H + 2 * b_pad * T * H,
        transcendentals=b_pad * T * H,
        bytes_accessed=bytes_accessed)
    cparams = pltpu.CompilerParams(
        dimension_semantics=("parallel",),
        vmem_limit_bytes=32 * 1024 * 1024)   # safe on v7x; headroom on v5e/v6e

    if training:
        y_flat = y.reshape(g, 1, n_block)
        pred_flat, lbl_flat = pl.pallas_call(
            _fwd_train_kernel,
            out_shape=(jax.ShapeDtypeStruct((g, 1, n_block), jnp.float32),
                       jax.ShapeDtypeStruct((g, 1, n_block), jnp.float32)),
            grid_spec=pltpu.PrefetchScalarGridSpec(
                num_scalar_prefetch=0,
                grid=(g,),
                in_specs=[src_spec, tgt_spec, row_spec] + w_specs,
                out_specs=[row_spec, row_spec],
            ),
            compiler_params=cparams,
            cost_estimate=cost,
        )(src, tgt_flat, y_flat, w_src_b, w_tgt_b, w_out_row, b_out_2d)
        pred2d = pred_flat.reshape(b_pad, T)[:B]
        lbl = lbl_flat.reshape(b_pad, T)[:B]
    else:
        pred_flat = pl.pallas_call(
            _fwd_eval_kernel,
            out_shape=jax.ShapeDtypeStruct((g, 1, n_block), jnp.float32),
            grid_spec=pltpu.PrefetchScalarGridSpec(
                num_scalar_prefetch=0,
                grid=(g,),
                in_specs=[src_spec, tgt_spec] + w_specs,
                out_specs=row_spec,
            ),
            compiler_params=cparams,
            cost_estimate=cost,
        )(src, tgt_flat, w_src_b, w_tgt_b, w_out_row, b_out_2d)
        pred2d = pred_flat.reshape(b_pad, T)[:B]
        lbl = None

    # Module-faithful (B, T, 1) shape — free reshape outside the kernel.
    base_pred = pred2d[:, :, None]
    # The module calls self.base twice on identical inputs; with a deterministic
    # base the second call is bit-identical, so it is deduplicated.
    auxiliary_pred = base_pred
    if training:
        return base_pred, auxiliary_pred, lbl
    return base_pred, auxiliary_pred


# --------------------------------------------------------------------------
# Deterministic parameter init + demo
# --------------------------------------------------------------------------
def init_params(key, D, H):
    k1, k2, k3 = jax.random.split(key, 3)
    w_src = jax.random.normal(k1, (D, H), jnp.float32) * 0.05
    w_tgt = jax.random.normal(k2, (D, H), jnp.float32) * 0.05
    w_out = jax.random.normal(k3, (H, 1), jnp.float32) * 0.05
    b_out = jnp.full((1, 1), 0.1, jnp.float32)
    return w_src, w_tgt, w_out, b_out


if __name__ == "__main__":
    B, S, T, D, H = 2, 8, 8, 32, 32
    key = jax.random.PRNGKey(0)
    k_src, k_tgt, k_y, k_p = jax.random.split(key, 4)

    src = jax.random.normal(k_src, (B, S, D), jnp.float32)
    tgt = jax.random.normal(k_tgt, (B, T, D), jnp.float32)
    y = jax.random.normal(k_y, (B, T), jnp.float32)
    params = init_params(k_p, D, H)
    w_src, w_tgt, w_out, b_out = params

    base_pred, auxiliary_pred, auxiliary_label = with_auxiliary_forward(
        src, tgt, y, params=params, training=True)
    base_pred_e, auxiliary_pred_e = with_auxiliary_forward(
        src, tgt, params=params, training=False)
    jax.block_until_ready((base_pred, auxiliary_pred, auxiliary_label,
                           base_pred_e, auxiliary_pred_e))

    # --- reference 1: same math/ordering as the kernel (bf16 MXU operands) ---
    ctx_ref = jnp.dot(jnp.mean(src, axis=1).astype(jnp.bfloat16),
                      w_src.astype(jnp.bfloat16),
                      preferred_element_type=jnp.float32)
    h_ref = jnp.tanh(
        jnp.einsum("btd,dh->bth", tgt.astype(jnp.bfloat16),
                   w_tgt.astype(jnp.bfloat16),
                   preferred_element_type=jnp.float32) + ctx_ref[:, None, :])
    pred_ref = (jnp.sum(h_ref * w_out[:, 0][None, None, :], axis=-1)
                + b_out[0, 0])[:, :, None]

    # --- reference 2: original f32 module-order math (mean after projection) ---
    ctx32 = jnp.mean(jnp.einsum("bsd,dh->bsh", src, w_src), axis=1, keepdims=True)
    h32 = jnp.tanh(jnp.einsum("btd,dh->bth", tgt, w_tgt) + ctx32)
    pred32 = jnp.einsum("bth,ho->bto", h32, w_out) + b_out[0, 0]

    assert base_pred.shape == (B, T, 1) and auxiliary_label.shape == (B, T)
    assert jnp.allclose(base_pred, pred_ref, atol=5e-3), "kernel vs bf16 reference"
    assert jnp.allclose(base_pred, pred32, atol=3e-2), "kernel vs f32 reference"
    assert jnp.array_equal(auxiliary_pred, base_pred), "aux pred == base pred"
    assert jnp.allclose(auxiliary_label, y - base_pred[:, :, 0], atol=1e-6)
    assert jnp.allclose(base_pred_e, base_pred, atol=1e-6), "eval path matches"

    print("KERNEL_OK")
</pallas_src>

<mosaic_0001>
module attributes {stable_mosaic.version = 11 : i64} {
  func.func @_fwd_train_kernel(%arg0: i32, %arg1: memref<1x8x32xf32, #tpu.memory_space<vmem>>, %arg2: memref<8x32xf32, #tpu.memory_space<vmem>>, %arg3: memref<1x1x8xf32, #tpu.memory_space<vmem>>, %arg4: memref<32x32xbf16, #tpu.memory_space<vmem>>, %arg5: memref<32x32xbf16, #tpu.memory_space<vmem>>, %arg6: memref<1x32xf32, #tpu.memory_space<vmem>>, %arg7: memref<1x1xf32, #tpu.memory_space<smem>>, %arg8: memref<1x1x8xf32, #tpu.memory_space<vmem>>, %arg9: memref<1x1x8xf32, #tpu.memory_space<vmem>>) attributes {dimension_semantics = [#tpu.dimension_semantics<parallel>], iteration_bounds = array<i64: 2>, scalar_prefetch = 0 : i64, scratch_operands = 0 : i64, tpu.core_type = #tpu.core_type<tc>, window_params = [{transform_indices = @transform_0, window_bounds = array<i64: 1, 8, 32>}, {transform_indices = @transform_1, window_bounds = array<i64: 8, 32>}, {transform_indices = @transform_2, window_bounds = array<i64: 1, 1, 8>}, {pipeline_mode = #tpu.pipeline_mode<synchronous>, transform_indices = @transform_3, window_bounds = array<i64: 32, 32>}, {pipeline_mode = #tpu.pipeline_mode<synchronous>, transform_indices = @transform_4, window_bounds = array<i64: 32, 32>}, {pipeline_mode = #tpu.pipeline_mode<synchronous>, transform_indices = @transform_5, window_bounds = array<i64: 1, 32>}, {transform_indices = @transform_6, window_bounds = array<i64: 1, 1>}, {transform_indices = @transform_7, window_bounds = array<i64: 1, 1, 8>}, {transform_indices = @transform_8, window_bounds = array<i64: 1, 1, 8>}]} {
    %c0 = arith.constant 0 : index
    %c0_0 = arith.constant 0 : index
    %c0_1 = arith.constant 0 : index
    %0 = vector.load %arg1[%c0, %c0_0, %c0_1] : memref<1x8x32xf32, #tpu.memory_space<vmem>>, vector<1x8x32xf32>
    %cst = arith.constant dense<0.000000e+00> : vector<1x32xf32>
    %1 = vector.multi_reduction <add>, %0, %cst [1] : vector<1x8x32xf32> to vector<1x32xf32>
    %cst_2 = arith.constant 8.000000e+00 : f32
    %2 = vector.broadcast %cst_2 : f32 to vector<1x32xf32>
    %3 = arith.divf %1, %2 : vector<1x32xf32>
    %4 = arith.truncf %3 : vector<1x32xf32> to vector<1x32xbf16>
    %c0_3 = arith.constant 0 : index
    %c0_4 = arith.constant 0 : index
    %5 = vector.load %arg4[%c0_3, %c0_4] : memref<32x32xbf16, #tpu.memory_space<vmem>>, vector<32x32xbf16>
    %cst_5 = arith.constant dense<0.000000e+00> : vector<1x32xf32>
    %6 = tpu.matmul %4, %5, %cst_5 {dimension_numbers = #tpu.dot_dimension_numbers<[1], [0], [0], [1], [0, 0, 1, 1], [], []>} : vector<1x32xbf16>, vector<32x32xbf16>, vector<1x32xf32> -> vector<1x32xf32>
    %c0_6 = arith.constant 0 : index
    %c0_7 = arith.constant 0 : index
    %7 = vector.load %arg2[%c0_6, %c0_7] : memref<8x32xf32, #tpu.memory_space<vmem>>, vector<8x32xf32>
    %8 = arith.truncf %7 : vector<8x32xf32> to vector<8x32xbf16>
    %c0_8 = arith.constant 0 : index
    %c0_9 = arith.constant 0 : index
    %9 = vector.load %arg5[%c0_8, %c0_9] : memref<32x32xbf16, #tpu.memory_space<vmem>>, vector<32x32xbf16>
    %cst_10 = arith.constant dense<0.000000e+00> : vector<8x32xf32>
    %10 = tpu.matmul %8, %9, %cst_10 {dimension_numbers = #tpu.dot_dimension_numbers<[1], [0], [0], [1], [0, 0, 1, 1], [], []>} : vector<8x32xbf16>, vector<32x32xbf16>, vector<8x32xf32> -> vector<8x32xf32>
    %11 = vector.shape_cast %6 : vector<1x32xf32> to vector<1x1x32xf32>
    %12 = vector.shape_cast %11 : vector<1x1x32xf32> to vector<1x1x32xf32>
    %13 = vector.broadcast %12 : vector<1x1x32xf32> to vector<1x8x32xf32>
    %14 = vector.shape_cast %13 : vector<1x8x32xf32> to vector<8x32xf32>
    %15 = arith.addf %10, %14 : vector<8x32xf32>
    %16 = math.tanh %15 : vector<8x32xf32>
    %c0_11 = arith.constant 0 : index
    %c0_12 = arith.constant 0 : index
    %17 = vector.load %arg6[%c0_11, %c0_12] : memref<1x32xf32, #tpu.memory_space<vmem>>, vector<1x32xf32>
    %18 = vector.broadcast %17 : vector<1x32xf32> to vector<8x32xf32>
    %19 = arith.mulf %16, %18 : vector<8x32xf32>
    %cst_13 = arith.constant dense<0.000000e+00> : vector<8xf32>
    %20 = vector.multi_reduction <add>, %19, %cst_13 [1] : vector<8x32xf32> to vector<8xf32>
    %21 = vector.shape_cast %20 : vector<8xf32> to vector<8x1xf32>
    %c0_14 = arith.constant 0 : index
    %c0_15 = arith.constant 0 : index
    %22 = memref.load %arg7[%c0_14, %c0_15] : memref<1x1xf32, #tpu.memory_space<smem>>
    %23 = vector.broadcast %22 : f32 to vector<8x1xf32>
    %24 = arith.addf %21, %23 : vector<8x1xf32>
    %25 = vector.shape_cast %24 : vector<8x1xf32> to vector<1x1x8xf32>
    %c0_16 = arith.constant 0 : index
    %c0_17 = arith.constant 0 : index
    %c0_18 = arith.constant 0 : index
    %26 = vector.load %arg8[%c0_16, %c0_17, %c0_18] : memref<1x1x8xf32, #tpu.memory_space<vmem>>, vector<1x1x8xf32>
    tpu.vector_store %arg8[%c0_16, %c0_17, %c0_18], %25 {strides = array<i32>} : memref<1x1x8xf32, #tpu.memory_space<vmem>>, vector<1x1x8xf32>,
    %c0_19 = arith.constant 0 : index
    %c0_20 = arith.constant 0 : index
    %c0_21 = arith.constant 0 : index
    %27 = vector.load %arg3[%c0_19, %c0_20, %c0_21] : memref<1x1x8xf32, #tpu.memory_space<vmem>>, vector<1x1x8xf32>
    %28 = arith.subf %27, %25 : vector<1x1x8xf32>
    %c0_22 = arith.constant 0 : index
    %c0_23 = arith.constant 0 : index
    %c0_24 = arith.constant 0 : index
    %29 = vector.load %arg9[%c0_22, %c0_23, %c0_24] : memref<1x1x8xf32, #tpu.memory_space<vmem>>, vector<1x1x8xf32>
    tpu.vector_store %arg9[%c0_22, %c0_23, %c0_24], %28 {strides = array<i32>} : memref<1x1x8xf32, #tpu.memory_space<vmem>>, vector<1x1x8xf32>,
    return
  }
  func.func @transform_0(%arg0: i32) -> (i32, i32, i32) {
    %c0_i32 = arith.constant 0 : i32
    %c0_i32_0 = arith.constant 0 : i32
    %c0_i32_1 = arith.constant 0 : i32
    return %arg0, %c0_i32, %c0_i32_0 : i32, i32, i32
  }
  func.func @transform_1(%arg0: i32) -> (i32, i32) {
    %c0_i32 = arith.constant 0 : i32
    %c0_i32_0 = arith.constant 0 : i32
    return %arg0, %c0_i32 : i32, i32
  }
  func.func @transform_2(%arg0: i32) -> (i32, i32, i32) {
    %c0_i32 = arith.constant 0 : i32
    %c0_i32_0 = arith.constant 0 : i32
    %c0_i32_1 = arith.constant 0 : i32
    return %arg0, %c0_i32, %c0_i32_0 : i32, i32, i32
  }
  func.func @transform_3(%arg0: i32) -> (i32, i32) {
    %c0_i32 = arith.constant 0 : i32
    %c0_i32_0 = arith.constant 0 : i32
    %c0_i32_1 = arith.constant 0 : i32
    return %c0_i32, %c0_i32_0 : i32, i32
  }
  func.func @transform_4(%arg0: i32) -> (i32, i32) {
    %c0_i32 = arith.constant 0 : i32
    %c0_i32_0 = arith.constant 0 : i32
    %c0_i32_1 = arith.constant 0 : i32
    return %c0_i32, %c0_i32_0 : i32, i32
  }
  func.func @transform_5(%arg0: i32) -> (i32, i32) {
    %c0_i32 = arith.constant 0 : i32
    %c0_i32_0 = arith.constant 0 : i32
    %c0_i32_1 = arith.constant 0 : i32
    return %c0_i32, %c0_i32_0 : i32, i32
  }
  func.func @transform_6(%arg0: i32) -> (i32, i32) {
    %c0_i32 = arith.constant 0 : i32
    %c0_i32_0 = arith.constant 0 : i32
    %c0_i32_1 = arith.constant 0 : i32
    return %c0_i32, %c0_i32_0 : i32, i32
  }
  func.func @transform_7(%arg0: i32) -> (i32, i32, i32) {
    %c0_i32 = arith.constant 0 : i32
    %c0_i32_0 = arith.constant 0 : i32
    %c0_i32_1 = arith.constant 0 : i32
    return %arg0, %c0_i32, %c0_i32_0 : i32, i32, i32
  }
  func.func @transform_8(%arg0: i32) -> (i32, i32, i32) {
    %c0_i32 = arith.constant 0 : i32
    %c0_i32_0 = arith.constant 0 : i32
    %c0_i32_1 = arith.constant 0 : i32
    return %arg0, %c0_i32, %c0_i32_0 : i32, i32, i32
  }
}

</mosaic_0001>

<bundles_post_ra>
// kernel: tpu_custom_call.1
= control target key start
LH: loop header
LB: loop body
LE: loop exit
PB: predicated region body
PF: predicated region fallthrough
CT: control target
= control target key end

     0   :  { %s1533_s0 = inlined_call_operand.hbm [shape: f32[2,8,32], index: 0, kind: input, shape index: {}]   ;;  %s1534_s1 = inlined_call_operand.hbm [shape: f32[16,32], index: 1, kind: input, shape index: {}]   ;;  %s1535_s2 = inlined_call_operand.vmem [shape: f32[2,1,8], index: 2, kind: input, shape index: {}]   ;;  %s1536_s3 = inlined_call_operand.hbm [shape: bf16[32,32], index: 3, kind: input, shape index: {}]   ;;  %s1537_s4 = inlined_call_operand.hbm [shape: bf16[32,32], index: 4, kind: input, shape index: {}]   ;;  %s1538_s5 = inlined_call_operand.vmem [shape: f32[1,32], index: 5, kind: input, shape index: {}]   ;;  %s1539_s6 = inlined_call_operand.<no memory space> [shape: f32[1,1], index: 6, kind: input, shape index: {}]   ;;  %s1540_s7 = inlined_call_operand.hbm [shape: f32[2,1,8], index: 7, kind: output, shape index: {0}]   ;;  %s1541_s8 = inlined_call_operand.hbm [shape: f32[2,1,8], index: 8, kind: output, shape index: {1}]  }
   0x1   :  { %1547 = sst [smem:[#allocation22_spill]] %s1536_s3 }
   0x2   :  { %1548 = sst [smem:[#allocation23_spill]] %s1537_s4 }
   0x3   :  { %14 = sst [smem:[#allocation2]] %s1539_s6 }
   0x4   :  { %15 = vsyncpa [#allocation4], 0 }
   0x5   :  { %17 = vsyncpa [#allocation4 + $0x1], 0 }
   0x6   :  { %18 = vsyncpa [#allocation7], 0 }
   0x7   :  { %20 = vsyncpa [#allocation7 + $0x1], 0 }
   0x8   :  { %21 = vsyncpa [#allocation10], 0 }
   0x9   :  { %22 = vsyncpa [#allocation5], 0 }
   0xa   :  { %24 = vsyncpa [#allocation5 + $0x1], 0 }
   0xb   :  { %25 = vsyncpa [#allocation13], 0 }
   0xc   :  { %27 = vsyncpa [#allocation13 + $0x1], 0  ;;  %s1267_s29 = smov 0   ;;  %s1269_s30 = smov 0  }
   0xd   :  { %s1271_s9 = smov 0   ;;  %s1273_s10 = smov 0  }
   0xe LB: > { %1549 = sst [smem:[#allocation20_spill]] %s1201_s9  ;;  %s1288_s6 = sadd.s32 4294967295, %s1205_s10   ;;  %s1205_s10 = sphi %s1273_s10, %s1573_s10   ;;  %s1201_s9 = sphi %s1271_s9, %s1570_s9   ;;  %s1197_s30 = sphi %s1269_s30, %s1572_s30   ;;  %s1193_s29 = sphi %s1267_s29, %s1571_s29  }
   0xf   : > { %s854_s11 = sadd.s32 4294967294, %s1205_s10   ;;  %p53_p0 = scmp.ne.s32.totalorder %s1197_s30, %s1193_s29 }
  0x10   : > { %p1542_p1 = scmp.eq.s32.totalorder %s1288_s6, 0  ;;  %p219_p3 = scmp.eq.s32.totalorder %s854_s11, 1 }
  0x11   : > { %p855_p5 = scmp.ge.s32.totalorder %s1205_s10, 1  ;;  %p252_p7 = scmp.lt.s32.totalorder %s1205_s10, 3 }
  0x12   : > { %p1297_p4 = por %p1542_p1, %p53_p0  ;;  %p1302_p6 = por %p219_p3, %p53_p0 }
  0x13   : > { %p1307_p8 = pnand %p855_p5, %p252_p7  ;;  %s1207_s15 = smov [#allocation8]  }
  0x14   : > { %s1550_s12 = scalar_select %p1297_p4, 1, 0 }
  0x15   : > { %s1551_s13 = scalar_select %p1302_p6, 1, 0 }
  0x16   : > { %s1552_s14 = scalar_select %p1307_p8, 1, 0 }
  0x17   : > { %s264_s16 = sshll.u32 %s1207_s15, 4  ;;  %p917_p9 = pneg %p1307_p8  ;;  %s265_s16 = int_to_ptr.vmem [resolvable:$true] %s264_s16 }
  0x18   : > { %s1208_s18 = smov [#allocation9]   ;;  %s1002_s20 = scalar_lea.vmem %s265_s16, 256 }
  0x19   : > { %p1316_p11 = pnand %p917_p9, %p1542_p1  ;;  %s277_s19 = sshll.u32 %s1208_s18, 4  ;;  %s278_s19 = int_to_ptr.vmem [resolvable:$true] %s277_s19 }
  0x1a   : > { %p1003_p13 = scmp.ne.s32.totalorder %s265_s16, %s1002_s20  ;;  %p1010_p5 = scmp.lt.s32.totalorder %s265_s16, %s265_s16 }
  0x1b   : > { %p993_p12 = pneg %p1316_p11  ;;  %p1011_p7 = scmp.lt.s32.totalorder %s1002_s20, %s1002_s20 }
  0x1d   : > { %p1005_p0 = pnand %p1003_p13, %p993_p12  ;;  %p1012_p10 = por %p1011_p7, %p1010_p5 }
  0x1f   : > { %p1006_p3 = pneg %p1005_p0 }
  0x21   : > { %p1013_p9 = pnand %p1012_p10, %p1006_p3 }
  0x23   : > { %1016 = shalt.err (!%p1013_p9)
}
  0x24   : > { %s1209_s21 = smov 64   ;;  %s1210_s22 = smov 4  }
  0x25   : > { %s1554_s3 = sld [smem:[#allocation22_spill]]  ;;  %s1028_s25 = scalar_lea.vmem %s278_s19, 256 }
  0x26   : > { %p1029_p1 = scmp.ne.s32.totalorder %s278_s19, %s1028_s25  ;;  %p1036_p2 = scmp.lt.s32.totalorder %s278_s19, %s278_s19 }
  0x27   : > { %p1037_p6 = scmp.lt.s32.totalorder %s1028_s25, %s1028_s25 }
  0x28   : > { %p1031_p13 = pnand %p1029_p1, %p993_p12 }
  0x29   : > { %p1038_p5 = por %p1037_p6, %p1036_p2 }
  0x2a   : > { %p1032_p0 = pneg %p1031_p13 }
  0x2b   : > { %920 = dma.hbm_to_vmem [thread:$0]  (!%p1316_p11), %s1554_s3, 256, %s265_s16, [#allocation7], %s1209_s21, %s1209_s21, %s1210_s22  }
  0x2c   : > { %p1039_p10 = pnand %p1038_p5, %p1032_p0 }
  0x2e   : > { %1042 = shalt.err (!%p1039_p10)
}
  0x2f   : > { %s1555_s4 = sld [smem:[#allocation23_spill]]  ;;  %s1339_s28 = sadd.s32 1, %s1205_s10  }
  0x30   : > { %s40_s11 = sadd.s32 1, %s1201_s9  ;;  %s37_s15 = ssub.s32 %s1205_s10, %s1339_s28 }
  0x31   : > { %p47_p1 = scmp.ne.s32.totalorder %s1201_s9, %s1197_s30  ;;  %p38_p2 = scmp.eq.s32.totalorder %s37_s15, 0 }
  0x32   : > { %p48_p6 = scmp.eq.s32.totalorder %s1205_s10, 0  ;;  %p1556_p12 = scmp.eq.s32.totalorder %s1288_s6, 1 }
  0x33   : > { %p940_p7 = scmp.lt.s32.totalorder %s1205_s10, 2  ;;  %s297_s18 = sand.u32 1, %s1201_s9  }
  0x34   : > { %p1349_p3 = por %p1556_p12, %p47_p1  ;;  %p49_p9 = por %p48_p6, %p47_p1 }
  0x35   : > { %923 = dma.hbm_to_vmem [thread:$0]  (!%p1316_p11), %s1555_s4, 256, %s278_s19, [#allocation10], %s1209_s21, %s1209_s21, %s1210_s22  }
  0x36   : > { %s1557_s16 = scalar_select %p1349_p3, 1, 0 }
  0x37   : > { %s1355_s17 = scalar_select %p38_p2, %s1201_s9, %s40_s11  }
  0x38   : > { %s1358_s19 = sshll.u32 %s297_s18, 3  ;;  %s860_s20 = sshll.u32 %s1205_s10, 7 }
  0x39   : > { %1558 = sst [smem:[#allocation21_spill]] %s1355_s17  ;;  %s1364_s23 = scalar_lea.hbm %s1533_s0, %s860_s20 }
  0x3a   : > { %s301_s24 = scalar_lea.vmem [#allocation3], %s1358_s19  ;;  %p1369_p11 = pnand %p940_p7, %p49_p9 }
  0x3b   : > { %s308_s25 = sshll.u32 %s301_s24, 4  ;;  %s1376_s15 = scalar_lea.hbm %s1534_s1, %s860_s20  ;;  %s1367_s25 = int_to_ptr.vmem [resolvable:$true] %s308_s25 }
  0x3c   : > { %s315_s21 = sand.u32 1, %s1205_s10   ;;  %s298_s22 = scalar_lea.sflag [#allocation4], %s297_s18 }
  0x3d   : > { %s1043_s3 = scalar_lea.hbm %s1364_s23, 128  ;;  %p1045_p0 = pneg %p1369_p11 }
  0x3e   : > { %p1044_p13 = scmp.ne.s32.totalorder %s1364_s23, %s1043_s3  ;;  %s1048_s17 = scalar_lea.hbm %s1533_s0, 256 }
  0x3f   : > { %p1049_p1 = scmp.lt.s32.totalorder %s1364_s23, %s1533_s0  ;;  %p1050_p2 = scmp.lt.s32.totalorder %s1048_s17, %s1043_s3 }
  0x40   : > { %p1046_p5 = pnand %p1045_p0, %p1044_p13 }
  0x41   : > { %p1051_p6 = por %p1050_p2, %p1049_p1 }
  0x42   : > { %p1047_p10 = pneg %p1046_p5 }
  0x44   : > { %p1052_p12 = pnand %p1051_p6, %p1047_p10 }
  0x46   : > { %1055 = shalt.err (!%p1052_p12)
}
  0x47   : > { %s1056_s18 = scalar_lea.vmem %s1367_s25, 128  ;;  %s1211_s4 = smov [#allocation3]  }
  0x48   : > { %p1057_p7 = scmp.ne.s32.totalorder %s1367_s25, %s1056_s18  ;;  %s1061_s20 = sshll.u32 %s1211_s4, 4  ;;  %s1062_s20 = int_to_ptr.vmem [resolvable:$false] %s1061_s20 }
  0x49   : > { %s1063_s11 = scalar_lea.vmem %s1062_s20, 256  ;;  %p1064_p5 = scmp.lt.s32.totalorder %s1367_s25, %s1062_s20 }
  0x4a   : > { %p1059_p9 = pnand %p1057_p7, %p1045_p0  ;;  %p1065_p3 = scmp.lt.s32.totalorder %s1063_s11, %s1056_s18 }
  0x4c   : > { %p1060_p13 = pneg %p1059_p9  ;;  %p1066_p4 = por %p1065_p3, %p1064_p5 }
  0x4e   : > { %p1067_p1 = pnand %p1066_p4, %p1060_p13 }
  0x50   : > { %1070 = shalt.err (!%p1067_p1)
}
  0x51   : > { %927 = dma.hbm_to_vmem [thread:$0]  (!%p1369_p11), %s1364_s23, 128, %s1367_s25, %s298_s22  }
  0x52   : > { %s319_s3 = scalar_lea.vmem [#allocation6], %s1358_s19  ;;  %s316_s17 = scalar_lea.sflag [#allocation7], %s315_s21 }
  0x53   : > { %s326_s9 = sshll.u32 %s319_s3, 4  ;;  %s1071_s24 = scalar_lea.hbm %s1376_s15, 128  ;;  %s327_s9 = int_to_ptr.vmem [resolvable:$true] %s326_s9 }
  0x54   : > { %p1072_p3 = scmp.ne.s32.totalorder %s1376_s15, %s1071_s24  ;;  %s1076_s4 = scalar_lea.hbm %s1534_s1, 256 }
  0x55   : > { %p1077_p2 = scmp.lt.s32.totalorder %s1376_s15, %s1534_s1  ;;  %p1078_p6 = scmp.lt.s32.totalorder %s1076_s4, %s1071_s24 }
  0x56   : > { %p1074_p4 = pnand %p1072_p3, %p1045_p0 }
  0x57   : > { %p1079_p12 = por %p1078_p6, %p1077_p2 }
  0x58   : > { %p1075_p10 = pneg %p1074_p4 }
  0x5a   : > { %p1080_p7 = pnand %p1079_p12, %p1075_p10 }
  0x5c   : > { %1083 = shalt.err (!%p1080_p7)
}
  0x5d   : > { %s1084_s19 = scalar_lea.vmem %s327_s9, 128  ;;  %s1212_s23 = smov [#allocation6]  }
  0x5e   : > { %p1085_p9 = scmp.ne.s32.totalorder %s327_s9, %s1084_s19  ;;  %s1089_s25 = sshll.u32 %s1212_s23, 4  ;;  %s1090_s25 = int_to_ptr.vmem [resolvable:$false] %s1089_s25 }
  0x5f   : > { %s1091_s21 = scalar_lea.vmem %s1090_s25, 256  ;;  %p1092_p1 = scmp.lt.s32.totalorder %s327_s9, %s1090_s25 }
  0x60   : > { %p1087_p13 = pnand %p1085_p9, %p1045_p0  ;;  %p1093_p3 = scmp.lt.s32.totalorder %s1091_s21, %s1084_s19 }
  0x62   : > { %p1088_p5 = pneg %p1087_p13  ;;  %p1094_p4 = por %p1093_p3, %p1092_p1 }
  0x64   : > { %p1095_p8 = pnand %p1094_p4, %p1088_p5 }
  0x66   : > { %1098 = shalt.err (!%p1095_p8)
}
  0x67   : > { %930 = dma.hbm_to_vmem [thread:$0]  (!%p1369_p11), %s1376_s15, 128, %s327_s9, %s316_s17  }
  0x68   : > { %p1560_p10 = scmp.ne.s32.totalorder %s1552_s14, 0 }
  0x69   : > { %s1427_s22 = sand.u32 (!%p1560_p10), 1, %s1197_s30   ;;  %p1561_p0 = scmp.ne.s32.totalorder (!%p1560_p10), %s1550_s12, 0 }
  0x6a   : > { %341 = sbr.rel (%p1560_p10) target bundleno = 652 (0x28c), region = 48  ;;  %s864_s3 = sshll.u32 (!%p1560_p10), %s1427_s22, 3 }
  0x6b   : > { %s344_s24 = scalar_lea.sflag (!%p1560_p10), [#allocation4], %s1427_s22  ;;  %s347_s27 = scalar_lea.vmem (!%p1560_p10), [#allocation3], %s864_s3 }
  0x6f   : > { %1168 = dma.done.wait (%p1561_p0), %s344_s24, 128  }
  0x70   : > { %1170 = vsyncadd (%p1561_p0), %s344_s24, 4294967168  ;;  %s352_s26 = sand.u32 1, %s1288_s6   ;;  %s356_s14 = scalar_lea.vmem [#allocation6], %s864_s3 }
  0x71   : > { %s353_s15 = scalar_lea.sflag [#allocation7], %s352_s26 }
  0x72   : > { %1172 = dma.done.wait (%p1561_p0), %s353_s15, 128  }
  0x73   : > { %1174 = vsyncadd (%p1561_p0), %s353_s15, 4294967168  ;;  %p1562_p8 = scmp.eq.s32.totalorder %s1288_s6, 0 }
  0x75   : > { %1176 = dma.done.wait (%p1562_p8), [#allocation7], 256   ;;  %p1563_p11 = pmov %p1562_p8 }
  0x76   : > { %p1564_p2 = pmov %p1562_p8 }
  0x77   : > { %1178 = vsyncadd (%p1563_p11), [#allocation7], 4294967040 }
  0x78   : > { %1180 = dma.done.wait (%p1564_p2), [#allocation10], 256   ;;  %p1565_p6 = pmov %p1564_p2 }
  0x79   : > { %v1213_v0 = vmov 0.0   ;;  %vm1214_vm0 = vmmov 0   ;;  %v985_v1 = vld [vmem:[#allocation9 + $0x8] sm:$0xff]   ;;  %v986_v2 = vld [vmem:[#allocation8 + $0x8] sm:$0xff]   ;;  %vm413_vm1 = vcmask 261120   ;;  %v987_v3 = vld [vmem:[#allocation9] sm:$0xff]   ;;  %v489_v18 = vlaneseq }
  0x7a   : > { %1182 = vsyncadd (%p1565_p6), [#allocation10], 4294967040  ;;  %893 = vmatprep.subr.bf16.mxu1 %v1213_v0  ;;  %885 = vmatprep.subr.bf16.mxu0 %v1213_v0  ;;  %v412_v4 = vld [vmem:[%s347_s27] sm:$0xff]  ;;  %v483_v5 = vld [vmem:[%s356_s14] sm:$0xff]  ;;  %v1215_v34 = vmov 0   ;;  %s560_s17 = sld [smem:[#allocation2]] }
  0x7b   : > { %897 = vmatprep.mubr.msk.bf16.mxu1 %vm1214_vm0, %v1213_v0  ;;  %889 = vmatprep.mubr.msk.bf16.mxu0 %vm1214_vm0, %v1213_v0  ;;  %v414_v6 = vsel %vm413_vm1, %v412_v4, 0.0  ;;  %v988_v7 = vld [vmem:[#allocation8] sm:$0xff]   ;;  %v484_v9 = vpack.c.bf16 %v483_v5, %v483_v5  ;;  %v490_v21 = vshrl.u32 %v489_v18, 7  ;;  %v1216_v35 = vmov 1966171168   ;;  %s401_s18 = scalar_lea.vmem [#allocation11], %s1427_s22 }
  0x7c   : > { %894 = vmatpush3.bf16.msra.mxu1 %v985_v1  ;;  %886 = vmatpush3.bf16.msra.mxu0 %v986_v2  ;;  %v415_v8 = vrot.slane %v414_v6, 4  ;;  %v874_v30 = vld [vmem:[%s1538_s5] ss:$0 sm:$0xff]  ;;  %v611_v36 = vunpack.c.l.s4 %v1216_v35  ;;  %v565_v37 = vand.u32 127, %v489_v18  ;;  %vm571_vm2 = vcmask 57344   ;;  %s875_s4 = sshll.u32 %s1288_s6, 4 }
  0x7d   : > { %895 = vmatprep.subr.bf16.mxu1 %v1213_v0  ;;  %887 = vmatprep.subr.bf16.mxu0 %v1213_v0  ;;  %v491_v23 = vsub.s32 0, %v490_v21  ;;  %v580_v40 = vsub.s32 1, %v490_v21  ;;  %v584_v41 = vsub.s32 2, %v490_v21  ;;  %v588_v42 = vsub.s32 3, %v490_v21  ;;  %s694_s19 = scalar_lea.hbm %s1540_s7, %s875_s4  ;;  %s696_s23 = sshll.u32 %s401_s18, 4  ;;  %s697_s23 = int_to_ptr.vmem [resolvable:$true] %s696_s23 }
  0x7e   : > { %v416_v10 = vadd.f32 %v415_v8, %v414_v6  ;;  %984 = vset.pattern.permute.xlu0 %v1215_v34  ;;  %v612_v39 = vunpack.c.0.s8 %v611_v36  ;;  %v592_v44 = vsub.s32 4, %v490_v21  ;;  %v596_v45 = vsub.s32 5, %v490_v21  ;;  %s680_s25 = scalar_lea.sflag [#allocation5], %s1427_s22  ;;  %s1099_s21 = scalar_lea.vmem %s697_s23, 16 }
  0x7f   : > { %v600_v46 = vsub.s32 6, %v490_v21  ;;  %v604_v47 = vsub.s32 7, %v490_v21  ;;  %v1455_v49 = vsub.s32 %v565_v37, %v490_v21  ;;  %p1100_p12 = scmp.ne.s32.totalorder %s697_s23, %s1099_s21  ;;  %p1566_p7 = scmp.ne.s32.totalorder %s1557_s16, 0 }
  0x80   : > { %896 = vmatpush3.bf16.msra.mxu1 %v987_v3  ;;  %888 = vmatpush3.bf16.msra.mxu0 %v988_v7  ;;  %v417_v11 = vrot.slane %v416_v10, 2  ;;  %v561_v38 = vstv %s560_s17  ;;  %v1457_v50 = vsub.s32 %v612_v39, %v490_v21  ;;  %s1217_s3 = smov [#allocation11]  }
  0x81   : > { %p1101_p9 = pnand %p1100_p12, %p1566_p7  ;;  %s1103_s24 = sshll.u32 %s1217_s3, 4  ;;  %s1104_s24 = int_to_ptr.vmem [resolvable:$false] %s1103_s24 }
  0x82   : > { %v418_v12 = vadd.f32 %v417_v11, %v416_v10  ;;  %s1105_s27 = scalar_lea.vmem %s1104_s24, 32  ;;  %p1106_p5 = scmp.lt.s32.totalorder %s697_s23, %s1104_s24 }
  0x83   : > { %898 = vmatmul.mubr.msk.bf16.vlgmr.msra.gmra.mxu1 %vm413_vm1, %v484_v9  ;;  %p1102_p13 = pneg %p1101_p9  ;;  %p1107_p1 = scmp.lt.s32.totalorder %s1105_s27, %s1099_s21 }
  0x84   : > { %v419_v13 = vrot.slane %v418_v12, 1 }
  0x85   : > { %p1108_p3 = por %p1107_p1, %p1106_p5 }
  0x86   : > { %v420_v14 = vadd.f32 %v419_v13, %v418_v12 }
  0x87   : > { %p1109_p4 = pnand %p1108_p3, %p1102_p13 }
  0x88   : > { %v422_v15 = vmul.f32 0.125, %v420_v14 }
  0x8a   : > { %v423_v16 = vpack.c.bf16 %v422_v15, %v422_v15 }
  0x8c   : > { %890 = vmatmul.mubr.msk.bf16.vlgmr.msra.gmra.mxu0 %vm413_vm1, %v423_v16 }
 0x143   : > { %v542_v17 = vpop.f32.mrf.mxu1 }
 0x145   : > { %v899_v19 = vpop.f32.mrf.mxu1 }
 0x147   : > { %v545_v20 = vpop.f32.mrf.mxu1 }
 0x149   : > { %v900_v22 = vpop.f32.mrf.mxu1 }
 0x14c   : > { %v477_v24 = vpop.f32.mrf.mxu0 }
 0x14d   : > { %v492_v25 = vrot.slane %v477_v24, %v491_v23 }
 0x14e   : > { %v891_v26 = vpop.f32.mrf.mxu0 }
 0x14f   : > { %v543_v27 = vadd.f32 %v542_v17, %v492_v25 }
 0x150   : > { %v480_v28 = vpop.f32.mrf.mxu0 }
 0x151   : > { %989 = vtanh.f32 %v543_v27 }
 0x152   : > { %v892_v29 = vpop.f32.mrf.mxu0 }
 0x15e   : > { %v990_v31 = vpop.eup %989 }
 0x15f   : > { %v556_v32 = vmul.f32 %v990_v31, %v874_v30 }
 0x161   : > { %v557_v33 = vsel %vm413_vm1, %v556_v32, 0.0 }
 0x162   : > { %558 = vadd.xlane.f32.xlu0 %v557_v33 }
 0x1eb   : > { %v559_v43 = vpop.xlane.xlu0 %558 }
 0x1ec   : > { %v562_v48 = vadd.f32 %v561_v38, %v559_v43 }
 0x1ee   : > { %v577_v51 = vrot.slane %v562_v48, %v491_v23  ;;  %v581_v52 = vrot.slane %v562_v48, %v580_v40  ;;  %v585_v53 = vrot.slane %v562_v48, %v584_v41  ;;  %v589_v54 = vrot.slane %v562_v48, %v588_v42 }
 0x1ef   : > { %v593_v55 = vrot.slane %v562_v48, %v592_v44  ;;  %v597_v56 = vrot.slane %v562_v48, %v596_v45  ;;  %v601_v57 = vrot.slane %v562_v48, %v600_v46  ;;  %v605_v58 = vrot.slane %v562_v48, %v604_v47 }
 0x1f0   : > { %v606_v59 = vcombine.low %v577_v51, %v581_v52  ;;  %v607_v60 = vcombine.low %v585_v53, %v589_v54  ;;  %v569_v61 = vrot.slane %v562_v48, %v1455_v49 }
 0x1f1   : > { %v608_v62 = vcombine.low %v593_v55, %v597_v56  ;;  %v609_v63 = vcombine.low %v601_v57, %v605_v58 }
 0x1f2   : > { %v616_v0 = vrot.slane %v606_v59, %v1457_v50  ;;  %v623_v1 = vrot.slane %v607_v60, %v1457_v50  ;;  %572 = vst.msk [vmem:[%s401_s18] sm:$0x1] %vm571_vm2, %v569_v61 }
 0x1f3   : > { %v630_v2 = vrot.slane %v608_v62, %v1457_v50  ;;  %v637_v3 = vrot.slane %v609_v63, %v1457_v50 }
 0x1f4   : > { %v638_v4 = vcombine.low %v616_v0, %v623_v1 }
 0x1f5   : > { %v639_v5 = vcombine.low %v630_v2, %v637_v3 }
 0x1f6   : > { %v646_v6 = vrot.slane %v638_v4, %v1457_v50 }
 0x1f7   : > { %v653_v7 = vrot.slane %v639_v5, %v1457_v50 }
 0x1f9   : > { %v654_v8 = vcombine.low %v646_v6, %v653_v7 }
 0x1fb   : > { %656 = vperm.xlu0 %984, %v654_v8  }
 0x1fc   : > { %1112 = shalt.err (!%p1109_p4)
}
 0x1fd   : > { %s1113_s26 = scalar_lea.hbm %s694_s19, 16  ;;  %s1117_s12 = scalar_lea.hbm %s1540_s7, 32 }
 0x1fe   : > { %p1114_p10 = scmp.ne.s32.totalorder %s694_s19, %s1113_s26  ;;  %p1118_p11 = scmp.lt.s32.totalorder %s694_s19, %s1540_s7 }
 0x1ff   : > { %p1119_p2 = scmp.lt.s32.totalorder %s1117_s12, %s1113_s26 }
 0x200   : > { %p1115_p0 = pnand %p1114_p10, %p1566_p7 }
 0x201   : > { %p1120_p6 = por %p1119_p2, %p1118_p11 }
 0x202   : > { %p1116_p8 = pneg %p1115_p0 }
 0x204   : > { %p1121_p12 = pnand %p1120_p6, %p1116_p8 }
 0x206   : > { %1124 = shalt.err (!%p1121_p12)
}
 0x207   : > { %913 = dma.vmem_to_hbm [thread:$0]  (%p1566_p7), %s697_s23, 16, %s694_s19, %s680_s25  }
 0x208   : > { %p408_p9 = scmp.lt.s32.totalorder %s1288_s6, 1  ;;  %s407_s3 = scalar_lea.vmem [#allocation12], %s1427_s22 }
 0x209   : > { %s709_s24 = sshll.u32 %s407_s3, 4  ;;  %s707_s25 = scalar_lea.hbm %s1541_s8, %s875_s4  ;;  %s710_s24 = int_to_ptr.vmem [resolvable:$true] %s709_s24 }
 0x20a   : > { %s409_s18 = scalar_select %p408_p9, %s1288_s6, 1 }
 0x20b   : > { %s684_s27 = scalar_lea.sflag [#allocation13], %s1427_s22  ;;  %s1125_s26 = scalar_lea.vmem %s710_s24, 16 }
 0x20c   : > { %s410_s21 = scalar_lea.vmem %s1535_s2, %s409_s18  ;;  %p1126_p13 = scmp.ne.s32.totalorder %s710_s24, %s1125_s26 }
 0x20d   : > { %v573_v12 = vld [vmem:[%s410_s21] sm:$0x1]  ;;  %s1218_s15 = smov [#allocation12]  }
 0x20e   : > { %p1127_p5 = pnand %p1126_p13, %p1566_p7  ;;  %s1129_s14 = sshll.u32 %s1218_s15, 4  ;;  %s1130_s14 = int_to_ptr.vmem [resolvable:$false] %s1129_s14 }
 0x20f   : > { %s1131_s12 = scalar_lea.vmem %s1130_s14, 32  ;;  %p1132_p3 = scmp.lt.s32.totalorder %s710_s24, %s1130_s14 }
 0x210   : > { %p1128_p1 = pneg %p1127_p5  ;;  %p1133_p4 = scmp.lt.s32.totalorder %s1131_s12, %s1125_s26 }
 0x212   : > { %p1134_p10 = por %p1133_p4, %p1132_p3 }
 0x214   : > { %p1135_p0 = pnand %p1134_p10, %p1128_p1 }
 0x276   : > { %v657_v9 = vpop.permute.xlu0 %656 }
 0x277   : > { %v661_v10 = vrot.slane %v657_v9, %v1455_v49 }
 0x279   : > { %v668_v11 = vrot.slane %v661_v10, %v1457_v50 }
 0x27b   : > { %v675_v13 = vrot.slane %v668_v11, %v1457_v50 }
 0x27d   : > { %v677_v14 = vsub.f32 %v573_v12, %v675_v13 }
 0x27f   : > { %678 = vst.msk [vmem:[%s407_s3] sm:$0x1] %vm571_vm2, %v677_v14 }
 0x280   : > { %1138 = shalt.err (!%p1135_p0)
}
 0x281   : > { %s1139_s6 = scalar_lea.hbm %s707_s25, 16  ;;  %s1143_s9 = scalar_lea.hbm %s1541_s8, 32 }
 0x282   : > { %p1140_p8 = scmp.ne.s32.totalorder %s707_s25, %s1139_s6  ;;  %p1144_p6 = scmp.lt.s32.totalorder %s707_s25, %s1541_s8 }
 0x283   : > { %p1145_p12 = scmp.lt.s32.totalorder %s1143_s9, %s1139_s6 }
 0x284   : > { %p1141_p11 = pnand %p1140_p8, %p1566_p7 }
 0x285   : > { %p1146_p9 = por %p1145_p12, %p1144_p6 }
 0x286   : > { %p1142_p2 = pneg %p1141_p11 }
 0x288   : > { %p1147_p13 = pnand %p1146_p9, %p1142_p2 }
 0x28a   : > { %1150 = shalt.err (!%p1147_p13)
}
 0x28b   : > { %914 = dma.vmem_to_hbm [thread:$0]  (%p1566_p7), %s710_s24, 16, %s707_s25, %s684_s27  }
 0x28c PF: > { %s721_s20 = sand.u32 1, %s1193_s29   ;;  %p1567_p5 = scmp.ne.s32.totalorder %s1551_s13, 0 }
 0x28d   : > { %p1568_p1 = scmp.ge.s32.totalorder %s1205_s10, 2  ;;  %s722_s11 = scalar_lea.sflag [#allocation5], %s721_s20 }
 0x28f   : > { %p932_p3 = pnand %p1568_p1, %p1567_p5 }
 0x291   : > { %p933_p4 = pneg %p932_p3 }
 0x293   : > { %1184 = dma.done.wait (%p933_p4), %s722_s11, 16  }
 0x294   : > { %1186 = vsyncadd (%p933_p4), %s722_s11, 4294967280  ;;  %s730_s21 = scalar_lea.sflag [#allocation13], %s721_s20 }
 0x295   : > { %1188 = dma.done.wait (%p933_p4), %s730_s21, 16  }
 0x296   : > { %1190 = vsyncadd (%p933_p4), %s730_s21, 4294967280  ;;  %s1569_s3 = sld [smem:[#allocation20_spill]]  ;;  %p30_p7 = scmp.ge.s32.totalorder %s1339_s28, 4  }
 0x297   : > { %s1570_s9 = sld [smem:[#allocation21_spill]]  ;;  %s1571_s29 = smov %s1197_s30 }
 0x298   : > { %s1573_s10 = smov %s1339_s28  ;;  %32 = sbr.rel (!%p30_p7) target bundleno = 14 (0xe), region = 134 }
 0x29c   : > { %s1572_s30 = smov %s1569_s3 }
 0x29d   :  { %734 = vsyncpa [#allocation4], 1 }
 0x29e   :  { %736 = vsyncpa [#allocation4 + $0x1], 1 }
 0x29f   :  { %737 = vsyncpa [#allocation7], 1 }
 0x2a0   :  { %739 = vsyncpa [#allocation7 + $0x1], 1 }
 0x2a1   :  { %740 = vsyncpa [#allocation10], 1 }
 0x2a2   :  { %741 = vsyncpa [#allocation5], 1 }
 0x2a3   :  { %743 = vsyncpa [#allocation5 + $0x1], 1 }
 0x2a4   :  { %744 = vsyncpa [#allocation13], 1 }
 0x2a5   :  { %746 = vsyncpa [#allocation13 + $0x1], 1 }

</bundles_post_ra>
